<compile_context>
chip_gen: v6e
topology: v6e:2x2x1
jax: 0.10.0
libtpu: 0.0.40
codegen_flags: <defaults>
</compile_context>

<pallas_src>
import functools

import jax
import jax.numpy as jnp
from jax.experimental import pallas as pl
from jax.experimental.pallas import tpu as pltpu


def _round_up(n, m):
    return ((n + m - 1) // m) * m


def _bf16_eltwise_ok():
    """bf16 VPU/EUP exists on v6e/v7x; v5e and earlier need the f32 path."""
    try:
        kind = jax.devices()[0].device_kind.lower()
    except Exception:
        return False
    return ("v6" in kind) or ("v7" in kind)


# ----------------------------- kernel ---------------------------------------

def _fc_kernel(x_ref, w1_ref, b1_ref, w2_ref, b2_ref, w3_ref, b3_ref, o_ref,
               *, bf16_tanh):
    # x_ref is bf16 already (cast host-side).  Dropout1/2 = identity (eval).
    # Layer 1: Linear (+ folded BN) -> Tanh.
    h1 = jnp.dot(x_ref[...], w1_ref[...], preferred_element_type=jnp.float32)
    h1 = h1 + b1_ref[...]                              # f32 bias add (VPU)
    if bf16_tanh:                                      # v6e/v7x: bf16 EUP
        h1 = jnp.tanh(h1.astype(jnp.bfloat16))
    else:                                              # v5e: f32 EUP only
        h1 = jnp.tanh(h1).astype(jnp.bfloat16)

    # Layer 2: Linear (+ folded BN) -> Tanh.
    h2 = jnp.dot(h1, w2_ref[...], preferred_element_type=jnp.float32)
    h2 = h2 + b2_ref[...]
    if bf16_tanh:
        h2 = jnp.tanh(h2.astype(jnp.bfloat16))
    else:
        h2 = jnp.tanh(h2).astype(jnp.bfloat16)

    # Layer 3: Linear (logits), lane-padded to a multiple of 128 columns.
    out = jnp.dot(h2, w3_ref[...], preferred_element_type=jnp.float32)
    o_ref[...] = (out + b3_ref[...]).astype(o_ref.dtype)


# ------------------------- host-side parameter prep -------------------------

def prepare_params(params, eps=1e-5):
    """Fold BatchNorm1d (running stats) + Linear bias into per-layer (W, b),
    transpose to (in, out), lane-pad logits to 128, cast weights to bf16.

    Call ONCE (outside the serving loop) — per-call forwards reuse the result.
    """
    def fold(w, b, g, be, m, v):
        scale = (g / jnp.sqrt(v + eps)).astype(jnp.float32)        # (out,)
        w_f = w.T.astype(jnp.float32) * scale[None, :]             # (in, out)
        b_f = (b.astype(jnp.float32) - m) * scale + be             # (out,)
        return w_f, b_f

    w1f, b1f = fold(params["w1"], params["b1"], params["g1"],
                    params["be1"], params["m1"], params["v1"])
    w2f, b2f = fold(params["w2"], params["b2"], params["g2"],
                    params["be2"], params["m2"], params["v2"])
    w3f = params["w3"].T.astype(jnp.float32)                       # (H2, C)
    b3f = params["b3"].astype(jnp.float32)

    h1 = w1f.shape[1]
    h2 = w2f.shape[1]
    num_classes = w3f.shape[1]
    nc_pad = _round_up(num_classes, 128)                           # lane-dense
    w3p = jnp.zeros((h2, nc_pad), jnp.float32).at[:, :num_classes].set(w3f)
    b3p = jnp.zeros((nc_pad,), jnp.float32).at[:num_classes].set(b3f)

    prepared = {
        "w1": w1f.astype(jnp.bfloat16),
        "b1": b1f.reshape(1, h1).astype(jnp.float32),
        "w2": w2f.astype(jnp.bfloat16),
        "b2": b2f.reshape(1, h2).astype(jnp.float32),
        "w3": w3p.astype(jnp.bfloat16),
        "b3": b3p.reshape(1, nc_pad).astype(jnp.float32),
        "num_classes": num_classes,
    }
    # Materialize now so no folding/cast work leaks into per-call forwards.
    for k, v in prepared.items():
        if isinstance(v, jax.Array):
            prepared[k] = jax.block_until_ready(v)
    return prepared


# ---------------------------- tile selection ---------------------------------

def _choose_tile_b(B, F, nc_pad, weight_bytes, vmem_budget=32 << 20):
    """Pick a batch tile from the VMEM budget; multiples of 256 for big B
    (v6e/v7x MXU M side), while keeping >= 2 grid steps so v7x's two
    TensorCores both get work."""
    B8 = _round_up(B, 8)
    # Streamed bytes per batch row: double-buffered bf16 x + f32 padded logits.
    per_row = 2 * (2 * F) + 2 * (4 * nc_pad)
    avail = vmem_budget - 2 * weight_bytes - (2 << 20)   # weights double-buffered
    t_vmem = max(avail // per_row, 8)

    if B8 <= 128:
        tile = B8                                         # single tile
    elif B8 <= 512:
        tile = _round_up(B8 // 2, 8)                      # 2 steps (megacore)
    else:
        tile = min(t_vmem, 1024, B8 // 2)                 # keep >= 2 steps
        tile = max((tile // 256) * 256, 256)              # multiple of 256
    tile = int(min(tile, t_vmem))
    return max((tile // 8) * 8, 8)


# ------------------------------- forward -------------------------------------

def fully_connected_forward(x_nchw, prepared, *, tile_b=None):
    """Fused FullyConnected forward (eval mode).

    x_nchw:   [B, C, H, W] array (flattened to [B, C*H*W] like x.view(B, -1)).
    prepared: output of prepare_params().
    """
    B = x_nchw.shape[0]
    x = x_nchw.reshape(B, -1).astype(jnp.bfloat16)        # bf16 x stream
    F = x.shape[1]

    w1, b1 = prepared["w1"], prepared["b1"]
    w2, b2 = prepared["w2"], prepared["b2"]
    w3, b3 = prepared["w3"], prepared["b3"]
    num_classes = prepared["num_classes"]
    H1, H2 = w1.shape[1], w2.shape[1]
    NC_PAD = w3.shape[1]

    weight_bytes = 2 * (F * H1 + H1 * H2 + H2 * NC_PAD)   # bf16 weights
    TILE_B = tile_b if tile_b is not None else _choose_tile_b(
        B, F, NC_PAD, weight_bytes)
    B_pad = _round_up(B, TILE_B)
    if B_pad != B:
        x = jnp.pad(x, ((0, B_pad - B), (0, 0)))
    grid = (B_pad // TILE_B,)

    kernel = functools.partial(_fc_kernel, bf16_tanh=_bf16_eltwise_ok())

    # NOTE: for much larger layer sizes on v7x (64 MiB VMEM), the grid-
    # invariant weight BlockSpecs can additionally be single-buffered via
    # pipeline_mode=pl.Buffered(1) to recover half the weight VMEM.
    out_padded = pl.pallas_call(
        kernel,
        out_shape=jax.ShapeDtypeStruct((B_pad, NC_PAD), jnp.float32),
        grid=grid,
        in_specs=[
            pl.BlockSpec((TILE_B, F), lambda i: (i, 0)),   # x: batch-tiled bf16
            pl.BlockSpec((F, H1), lambda i: (0, 0)),       # grid-invariant
            pl.BlockSpec((1, H1), lambda i: (0, 0)),
            pl.BlockSpec((H1, H2), lambda i: (0, 0)),
            pl.BlockSpec((1, H2), lambda i: (0, 0)),
            pl.BlockSpec((H2, NC_PAD), lambda i: (0, 0)),
            pl.BlockSpec((1, NC_PAD), lambda i: (0, 0)),
        ],
        out_specs=pl.BlockSpec((TILE_B, NC_PAD), lambda i: (i, 0)),
        compiler_params=pltpu.CompilerParams(
            dimension_semantics=("parallel",),
            vmem_limit_bytes=48 * 1024 * 1024,   # explicit (v5e default is 16 MiB)
        ),
    )(x, w1, b1, w2, b2, w3, b3)

    return out_padded[:B, :num_classes]


# ------------------------------ reference ------------------------------------

def _reference_forward(x_nchw, params):
    """Pure-JAX f32 reference mirroring the PyTorch eval-mode forward."""
    eps = 1e-5
    x = x_nchw.reshape(x_nchw.shape[0], -1)
    h = x @ params["w1"].T + params["b1"]
    h = (h - params["m1"]) / jnp.sqrt(params["v1"] + eps) * params["g1"] + params["be1"]
    h = jnp.tanh(h)
    h = h @ params["w2"].T + params["b2"]
    h = (h - params["m2"]) / jnp.sqrt(params["v2"] + eps) * params["g2"] + params["be2"]
    h = jnp.tanh(h)
    return h @ params["w3"].T + params["b3"]


def make_params(key, input_size, h1, h2, num_classes):
    ks = jax.random.split(key, 8)
    scale1 = 1.0 / jnp.sqrt(input_size)
    scale2 = 1.0 / jnp.sqrt(h1)
    scale3 = 1.0 / jnp.sqrt(h2)
    return {
        # nn.Linear weights: (out_features, in_features)
        "w1": jax.random.uniform(ks[0], (h1, input_size), jnp.float32, -scale1, scale1),
        "b1": jax.random.uniform(ks[1], (h1,), jnp.float32, -scale1, scale1),
        "w2": jax.random.uniform(ks[2], (h2, h1), jnp.float32, -scale2, scale2),
        "b2": jax.random.uniform(ks[3], (h2,), jnp.float32, -scale2, scale2),
        "w3": jax.random.uniform(ks[4], (num_classes, h2), jnp.float32, -scale3, scale3),
        "b3": jax.random.uniform(ks[5], (num_classes,), jnp.float32, -scale3, scale3),
        # BatchNorm1d affine + running stats (deterministic, non-trivial)
        "g1": 1.0 + 0.1 * jnp.sin(jnp.arange(h1, dtype=jnp.float32)),
        "be1": 0.05 * jnp.cos(jnp.arange(h1, dtype=jnp.float32)),
        "m1": 0.02 * jnp.sin(0.5 * jnp.arange(h1, dtype=jnp.float32)),
        "v1": 1.0 + 0.2 * jnp.abs(jnp.cos(jnp.arange(h1, dtype=jnp.float32))),
        "g2": 1.0 + 0.1 * jnp.cos(jnp.arange(h2, dtype=jnp.float32)),
        "be2": 0.05 * jnp.sin(jnp.arange(h2, dtype=jnp.float32)),
        "m2": 0.02 * jnp.cos(0.5 * jnp.arange(h2, dtype=jnp.float32)),
        "v2": 1.0 + 0.2 * jnp.abs(jnp.sin(jnp.arange(h2, dtype=jnp.float32))),
    }


if __name__ == "__main__":
    # MNIST-ish synthetic config: input image [1, 8, 8] -> input_size=64.
    # B=256 so the "parallel" batch grid has 2 steps (exercises megacore path).
    B, C, H, W = 256, 1, 8, 8
    input_size = C * H * W        # 64
    hidden1, hidden2 = 128, 64
    num_classes = 16

    key = jax.random.PRNGKey(0)
    kx, kp = jax.random.split(key)
    x = jax.random.normal(kx, (B, C, H, W), dtype=jnp.float32)
    params = make_params(kp, input_size, hidden1, hidden2, num_classes)

    # One-time weight prep (BN fold + transpose + pad + bf16) — reused per call.
    prepared = prepare_params(params)
    forward = jax.jit(lambda xx: fully_connected_forward(xx, prepared))

    out = forward(x)
    out = jax.block_until_ready(out)

    ref = _reference_forward(x, params)
    assert out.shape == (B, num_classes)
    # bf16 matmul inputs / bf16 tanh (f32 accumulate) -> loosened tolerance.
    assert jnp.allclose(out, ref, atol=5e-2, rtol=5e-2), "mismatch vs reference"

    print("KERNEL_OK")
</pallas_src>

<mosaic_0001>
module attributes {stable_mosaic.version = 11 : i64} {
  func.func @_fc_kernel(%arg0: i32, %arg1: memref<128x64xbf16, #tpu.memory_space<vmem>>, %arg2: memref<64x128xbf16, #tpu.memory_space<vmem>>, %arg3: memref<1x128xf32, #tpu.memory_space<vmem>>, %arg4: memref<128x64xbf16, #tpu.memory_space<vmem>>, %arg5: memref<1x64xf32, #tpu.memory_space<vmem>>, %arg6: memref<64x128xbf16, #tpu.memory_space<vmem>>, %arg7: memref<1x128xf32, #tpu.memory_space<vmem>>, %arg8: memref<128x128xf32, #tpu.memory_space<vmem>>) attributes {dimension_semantics = [#tpu.dimension_semantics<parallel>], iteration_bounds = array<i64: 2>, scalar_prefetch = 0 : i64, scratch_operands = 0 : i64, tpu.core_type = #tpu.core_type<tc>, window_params = [{transform_indices = @transform_0, window_bounds = array<i64: 128, 64>}, {pipeline_mode = #tpu.pipeline_mode<synchronous>, transform_indices = @transform_1, window_bounds = array<i64: 64, 128>}, {pipeline_mode = #tpu.pipeline_mode<synchronous>, transform_indices = @transform_2, window_bounds = array<i64: 1, 128>}, {pipeline_mode = #tpu.pipeline_mode<synchronous>, transform_indices = @transform_3, window_bounds = array<i64: 128, 64>}, {pipeline_mode = #tpu.pipeline_mode<synchronous>, transform_indices = @transform_4, window_bounds = array<i64: 1, 64>}, {pipeline_mode = #tpu.pipeline_mode<synchronous>, transform_indices = @transform_5, window_bounds = array<i64: 64, 128>}, {pipeline_mode = #tpu.pipeline_mode<synchronous>, transform_indices = @transform_6, window_bounds = array<i64: 1, 128>}, {transform_indices = @transform_7, window_bounds = array<i64: 128, 128>}]} {
    %c0 = arith.constant 0 : index
    %c0_0 = arith.constant 0 : index
    %0 = vector.load %arg1[%c0, %c0_0] : memref<128x64xbf16, #tpu.memory_space<vmem>>, vector<128x64xbf16>
    %c0_1 = arith.constant 0 : index
    %c0_2 = arith.constant 0 : index
    %1 = vector.load %arg2[%c0_1, %c0_2] : memref<64x128xbf16, #tpu.memory_space<vmem>>, vector<64x128xbf16>
    %cst = arith.constant dense<0.000000e+00> : vector<128x128xf32>
    %2 = tpu.matmul %0, %1, %cst {dimension_numbers = #tpu.dot_dimension_numbers<[1], [0], [0], [1], [0, 0, 1, 1], [], []>} : vector<128x64xbf16>, vector<64x128xbf16>, vector<128x128xf32> -> vector<128x128xf32>
    %c0_3 = arith.constant 0 : index
    %c0_4 = arith.constant 0 : index
    %3 = vector.load %arg3[%c0_3, %c0_4] : memref<1x128xf32, #tpu.memory_space<vmem>>, vector<1x128xf32>
    %4 = vector.broadcast %3 : vector<1x128xf32> to vector<128x128xf32>
    %5 = arith.addf %2, %4 : vector<128x128xf32>
    %6 = math.tanh %5 : vector<128x128xf32>
    %7 = arith.truncf %6 : vector<128x128xf32> to vector<128x128xbf16>
    %c0_5 = arith.constant 0 : index
    %c0_6 = arith.constant 0 : index
    %8 = vector.load %arg4[%c0_5, %c0_6] : memref<128x64xbf16, #tpu.memory_space<vmem>>, vector<128x64xbf16>
    %cst_7 = arith.constant dense<0.000000e+00> : vector<128x64xf32>
    %9 = tpu.matmul %7, %8, %cst_7 {dimension_numbers = #tpu.dot_dimension_numbers<[1], [0], [0], [1], [0, 0, 1, 1], [], []>} : vector<128x128xbf16>, vector<128x64xbf16>, vector<128x64xf32> -> vector<128x64xf32>
    %c0_8 = arith.constant 0 : index
    %c0_9 = arith.constant 0 : index
    %10 = vector.load %arg5[%c0_8, %c0_9] : memref<1x64xf32, #tpu.memory_space<vmem>>, vector<1x64xf32>
    %11 = vector.broadcast %10 : vector<1x64xf32> to vector<128x64xf32>
    %12 = arith.addf %9, %11 : vector<128x64xf32>
    %13 = math.tanh %12 : vector<128x64xf32>
    %14 = arith.truncf %13 : vector<128x64xf32> to vector<128x64xbf16>
    %c0_10 = arith.constant 0 : index
    %c0_11 = arith.constant 0 : index
    %15 = vector.load %arg6[%c0_10, %c0_11] : memref<64x128xbf16, #tpu.memory_space<vmem>>, vector<64x128xbf16>
    %cst_12 = arith.constant dense<0.000000e+00> : vector<128x128xf32>
    %16 = tpu.matmul %14, %15, %cst_12 {dimension_numbers = #tpu.dot_dimension_numbers<[1], [0], [0], [1], [0, 0, 1, 1], [], []>} : vector<128x64xbf16>, vector<64x128xbf16>, vector<128x128xf32> -> vector<128x128xf32>
    %c0_13 = arith.constant 0 : index
    %c0_14 = arith.constant 0 : index
    %17 = vector.load %arg7[%c0_13, %c0_14] : memref<1x128xf32, #tpu.memory_space<vmem>>, vector<1x128xf32>
    %18 = vector.broadcast %17 : vector<1x128xf32> to vector<128x128xf32>
    %19 = arith.addf %16, %18 : vector<128x128xf32>
    %c0_15 = arith.constant 0 : index
    %c0_16 = arith.constant 0 : index
    %20 = vector.load %arg8[%c0_15, %c0_16] : memref<128x128xf32, #tpu.memory_space<vmem>>, vector<128x128xf32>
    tpu.vector_store %arg8[%c0_15, %c0_16], %19 {strides = array<i32>} : memref<128x128xf32, #tpu.memory_space<vmem>>, vector<128x128xf32>,
    return
  }
  func.func @transform_0(%arg0: i32) -> (i32, i32) {
    %c0_i32 = arith.constant 0 : i32
    %c0_i32_0 = arith.constant 0 : i32
    return %arg0, %c0_i32 : i32, i32
  }
  func.func @transform_1(%arg0: i32) -> (i32, i32) {
    %c0_i32 = arith.constant 0 : i32
    %c0_i32_0 = arith.constant 0 : i32
    %c0_i32_1 = arith.constant 0 : i32
    return %c0_i32, %c0_i32_0 : i32, i32
  }
  func.func @transform_2(%arg0: i32) -> (i32, i32) {
    %c0_i32 = arith.constant 0 : i32
    %c0_i32_0 = arith.constant 0 : i32
    %c0_i32_1 = arith.constant 0 : i32
    return %c0_i32, %c0_i32_0 : i32, i32
  }
  func.func @transform_3(%arg0: i32) -> (i32, i32) {
    %c0_i32 = arith.constant 0 : i32
    %c0_i32_0 = arith.constant 0 : i32
    %c0_i32_1 = arith.constant 0 : i32
    return %c0_i32, %c0_i32_0 : i32, i32
  }
  func.func @transform_4(%arg0: i32) -> (i32, i32) {
    %c0_i32 = arith.constant 0 : i32
    %c0_i32_0 = arith.constant 0 : i32
    %c0_i32_1 = arith.constant 0 : i32
    return %c0_i32, %c0_i32_0 : i32, i32
  }
  func.func @transform_5(%arg0: i32) -> (i32, i32) {
    %c0_i32 = arith.constant 0 : i32
    %c0_i32_0 = arith.constant 0 : i32
    %c0_i32_1 = arith.constant 0 : i32
    return %c0_i32, %c0_i32_0 : i32, i32
  }
  func.func @transform_6(%arg0: i32) -> (i32, i32) {
    %c0_i32 = arith.constant 0 : i32
    %c0_i32_0 = arith.constant 0 : i32
    %c0_i32_1 = arith.constant 0 : i32
    return %c0_i32, %c0_i32_0 : i32, i32
  }
  func.func @transform_7(%arg0: i32) -> (i32, i32) {
    %c0_i32 = arith.constant 0 : i32
    %c0_i32_0 = arith.constant 0 : i32
    return %arg0, %c0_i32 : i32, i32
  }
}

</mosaic_0001>

<bundles_post_ra>
// kernel: _lambda_.1
= control target key start
LH: loop header
LB: loop body
LE: loop exit
PB: predicated region body
PF: predicated region fallthrough
CT: control target
= control target key end

     0   :  { %s1274_s24 = smov 0   ;;  %s1386_s0 = inlined_call_operand.vmem [shape: bf16[256,64], index: 0, kind: input, shape index: {}]   ;;  %s1387_s1 = inlined_call_operand.vmem [shape: bf16[64,128], index: 1, kind: input, shape index: {}]   ;;  %s1388_s2 = inlined_call_operand.vmem [shape: f32[1,128], index: 2, kind: input, shape index: {}]   ;;  %s1389_s3 = inlined_call_operand.vmem [shape: bf16[128,64], index: 3, kind: input, shape index: {}]   ;;  %s1390_s4 = inlined_call_operand.vmem [shape: f32[1,64], index: 4, kind: input, shape index: {}]   ;;  %s1391_s5 = inlined_call_operand.vmem [shape: bf16[64,128], index: 5, kind: input, shape index: {}]   ;;  %s1392_s6 = inlined_call_operand.vmem [shape: f32[1,128], index: 6, kind: input, shape index: {}]   ;;  %s1393_s7 = inlined_call_operand.vmem [shape: f32[256,128], index: 7, kind: output, shape index: {}]  }
   0x1 LB: > { %s948_s25 = sadd.s32 4294967295, %s1232_s24   ;;  %p952_p0 = scmp.ge.s32.totalorder %s1232_s24, 1  ;;  %s1232_s24 = sphi %s1274_s24, %s17_s24  }
   0x2   : > { %p238_p1 = scmp.lt.s32.totalorder %s1232_s24, 3 }
   0x4   : > { %p239_p2 = pnand %p952_p0, %p238_p1 }
   0x5   : > { %s953_s28 = sshll.u32 (!%p239_p2), %s948_s25, 4 }
   0x6   : > { %242 = sbr.rel (%p239_p2) target bundleno = 690 (0x2b2), region = 48  ;;  %p271_p3 = scmp.lt.s32.totalorder (!%p239_p2), %s953_s28, 31 }
   0xb   : > { %v1138_v0 = vld [vmem:[%s1387_s1 + $0x18] sm:$0xff]   ;;  %v1139_v1 = vld [vmem:[%s1387_s1 + $0x10] sm:$0xff]   ;;  %v1140_v2 = vld [vmem:[%s1387_s1 + $0x8] sm:$0xff]   ;;  %s1395_s28 = smov (!%p271_p3, %s953_s28), 31  ;;  %vm378_vm0 = vcmask 523264  }
   0xc   : > { %1042 = vmatprep.subr.bf16.mxu0 %v1138_v0  ;;  %v1150_v3 = vld [vmem:[%s1389_s3 + $0x38] sm:$0xff]   ;;  %s954_s12 = sshll.u32 %s1395_s28, 2  ;;  %v1151_v4 = vld [vmem:[%s1389_s3 + $0x30] sm:$0xff]   ;;  %v1141_v6 = vld [vmem:[%s1387_s1] sm:$0xff]   ;;  %s956_s23 = sshll.u32 %s1395_s28, 3 }
   0xd   : > { %1043 = vmatpush3.bf16.msra.mxu0 %v1138_v0  ;;  %s274_s17 = scalar_lea.vmem %s1386_s0, %s954_s12  ;;  %1066 = vmatprep.subr.bf16.mxu1 %v1150_v3  ;;  %v1152_v14 = vld [vmem:[%s1389_s3 + $0x28] sm:$0xff]   ;;  %v1153_v15 = vld [vmem:[%s1389_s3 + $0x20] sm:$0xff]   ;;  %v1154_v16 = vld [vmem:[%s1389_s3 + $0x18] sm:$0xff]   ;;  %s1365_s30 = scalar_lea.vmem %s1393_s7, %s956_s23 }
   0xe   : > { %1044 = vmatprep.subr.bf16.mxu0 %v1139_v1  ;;  %v1142_v5 = vld [vmem:[%s274_s17] sm:$0xff]   ;;  %1067 = vmatpush3.bf16.msra.mxu1 %v1150_v3  ;;  %v1143_v7 = vld [vmem:[%s274_s17 + $0x8] sm:$0xff]   ;;  %v1144_v8 = vld [vmem:[%s274_s17 + $0x10] sm:$0xff]  }
   0xf   : > { %1068 = vmatprep.subr.bf16.mxu1 %v1151_v4  ;;  %1050 = vmatprep.mubr.msk.bf16.mxu0 %vm378_vm0, %v1142_v5  ;;  %v1145_v9 = vld [vmem:[%s274_s17 + $0x18] sm:$0xff]   ;;  %v1146_v10 = vld [vmem:[%s274_s17 + $0x20] sm:$0xff]   ;;  %v1147_v11 = vld [vmem:[%s274_s17 + $0x28] sm:$0xff]  }
  0x10   : > { %v1148_v12 = vld [vmem:[%s274_s17 + $0x30] sm:$0xff]   ;;  %v1149_v13 = vld [vmem:[%s274_s17 + $0x38] sm:$0xff]   ;;  %v1156_v18 = vld [vmem:[%s1389_s3 + $0x8] sm:$0xff]  }
  0x11   : > { %1045 = vmatpush3.bf16.msra.mxu0 %v1139_v1  ;;  %v1155_v17 = vld [vmem:[%s1389_s3 + $0x10] sm:$0xff]   ;;  %v1157_v19 = vld [vmem:[%s1389_s3] sm:$0xff]  }
  0x12   : > { %1046 = vmatprep.subr.bf16.mxu0 %v1140_v2  ;;  %1069 = vmatpush3.bf16.msra.mxu1 %v1151_v4  ;;  %v957_v21 = vld [vmem:[%s1388_s2] ss:$0 sm:$0xff] }
  0x13   : > { %1070 = vmatprep.subr.bf16.mxu1 %v1152_v14 }
  0x15   : > { %1047 = vmatpush3.bf16.msra.mxu0 %v1140_v2 }
  0x16   : > { %1048 = vmatprep.subr.bf16.mxu0 %v1141_v6  ;;  %1071 = vmatpush3.bf16.msra.mxu1 %v1152_v14  ;;  %v1159_v14 = vld [vmem:[%s1391_s5 + $0x10] sm:$0xff]  }
  0x17   : > { %1072 = vmatprep.subr.bf16.mxu1 %v1153_v15 }
  0x19   : > { %1049 = vmatpush3.bf16.msra.mxu0 %v1141_v6 }
  0x1a   : > { %1073 = vmatpush3.bf16.msra.mxu1 %v1153_v15  ;;  %v1160_v15 = vld [vmem:[%s1391_s5 + $0x8] sm:$0xff]  }
  0x1b   : > { %1074 = vmatprep.subr.bf16.mxu1 %v1154_v16 }
  0x1c   : > { %1051 = vmatmul.mubr.msk.bf16.vlgmr.msra.gmra.mxu0 %vm378_vm0, %v1143_v7 }
  0x1d   : > { %1054 = vmatprep.mubr.msk.bf16.mxu0 %vm378_vm0, %v1144_v8 }
  0x1e   : > { %1075 = vmatpush3.bf16.msra.mxu1 %v1154_v16  ;;  %v1161_v16 = vld [vmem:[%s1391_s5] sm:$0xff]  }
  0x1f   : > { %1076 = vmatprep.subr.bf16.mxu1 %v1155_v17 }
  0x22   : > { %1077 = vmatpush3.bf16.msra.mxu1 %v1155_v17 }
  0x23   : > { %1078 = vmatprep.subr.bf16.mxu1 %v1156_v18 }
  0x24   : > { %1055 = vmatmul.mubr.msk.bf16.gmra.mxu0 %vm378_vm0, %v1145_v9 }
  0x25   : > { %1058 = vmatprep.mubr.msk.bf16.mxu0 %vm378_vm0, %v1146_v10 }
  0x26   : > { %1079 = vmatpush3.bf16.msra.mxu1 %v1156_v18  ;;  %v978_v18 = vld [vmem:[%s1390_s4] ss:$0 sm:$0xff] }
  0x27   : > { %1080 = vmatprep.subr.bf16.mxu1 %v1157_v19 }
  0x2a   : > { %1081 = vmatpush3.bf16.msra.mxu1 %v1157_v19 }
  0x2c   : > { %1059 = vmatmul.mubr.msk.bf16.gmra.mxu0 %vm378_vm0, %v1147_v11 }
  0x2d   : > { %1062 = vmatprep.mubr.msk.bf16.mxu0 %vm378_vm0, %v1148_v12 }
  0x34   : > { %1063 = vmatmul.mubr.msk.bf16.gmra.mxu0 %vm378_vm0, %v1149_v13  ;;  %v1158_v13 = vld [vmem:[%s1391_s5 + $0x18] sm:$0xff]  }
  0x35   : > { %1098 = vmatprep.subr.bf16.mxu0 %v1158_v13  ;;  %1122 = vmatprep.subr.bf16.mxu1 %v1158_v13 }
  0x36   : > { %1099 = vmatpush3.bf16.msra.mxu0 %v1158_v13 }
  0x37   : > { %1100 = vmatprep.subr.bf16.mxu0 %v1159_v14 }
  0x3a   : > { %1101 = vmatpush3.bf16.msra.mxu0 %v1159_v14 }
  0x3b   : > { %1102 = vmatprep.subr.bf16.mxu0 %v1160_v15 }
  0x3e   : > { %1103 = vmatpush3.bf16.msra.mxu0 %v1160_v15 }
  0x3f   : > { %1104 = vmatprep.subr.bf16.mxu0 %v1161_v16 }
  0x42   : > { %1105 = vmatpush3.bf16.msra.mxu0 %v1161_v16 }
  0xdc   : > { %v1052_v20 = vpop.f32.mrf.mxu0 }
  0xdd   : > { %v446_v26 = vadd.f32 %v1052_v20, %v957_v21 }
  0xde   : > { %v437_v22 = vpop.f32.mrf.mxu0 }
  0xdf   : > { %v438_v23 = vadd.f32 %v957_v21, %v437_v22 }
  0xe0   : > { %v1053_v24 = vpop.f32.mrf.mxu0 }
  0xe1   : > { %v449_v25 = vadd.f32 %v1053_v24, %v957_v21  ;;  %1162 = vtanh.f32 %v438_v23 }
  0xe2   : > { %v440_v27 = vpop.f32.mrf.mxu0 }
  0xe3   : > { %v441_v28 = vadd.f32 %v957_v21, %v440_v27  ;;  %1164 = vtanh.f32 %v449_v25 }
  0xe4   : > { %v1056_v29 = vpop.f32.mrf.mxu0 }
  0xe5   : > { %1166 = vtanh.f32 %v441_v28  ;;  %v462_v34 = vadd.f32 %v1056_v29, %v957_v21 }
  0xe6   : > { %1168 = vtanh.f32 %v446_v26  ;;  %v453_v30 = vpop.f32.mrf.mxu0 }
  0xe7   : > { %v454_v31 = vadd.f32 %v957_v21, %v453_v30 }
  0xe8   : > { %v1057_v32 = vpop.f32.mrf.mxu0 }
  0xe9   : > { %v465_v33 = vadd.f32 %v1057_v32, %v957_v21  ;;  %1170 = vtanh.f32 %v454_v31 }
  0xea   : > { %v456_v35 = vpop.f32.mrf.mxu0 }
  0xeb   : > { %v457_v36 = vadd.f32 %v957_v21, %v456_v35  ;;  %1172 = vtanh.f32 %v465_v33 }
  0xec   : > { %v1060_v37 = vpop.f32.mrf.mxu0 }
  0xed   : > { %1174 = vtanh.f32 %v457_v36  ;;  %v478_v45 = vadd.f32 %v1060_v37, %v957_v21 }
  0xee   : > { %1176 = vtanh.f32 %v462_v34  ;;  %v469_v38 = vpop.f32.mrf.mxu0  ;;  %v1163_v40 = vpop.eup %1162 }
  0xef   : > { %v470_v39 = vadd.f32 %v957_v21, %v469_v38 }
  0xf0   : > { %v1061_v41 = vpop.f32.mrf.mxu0  ;;  %v1165_v42 = vpop.eup %1164 }
  0xf1   : > { %v481_v43 = vadd.f32 %v1061_v41, %v957_v21  ;;  %1178 = vtanh.f32 %v470_v39 }
  0xf2   : > { %v1167_v44 = vpop.eup %1166  ;;  %v472_v46 = vpop.f32.mrf.mxu0 }
  0xf3   : > { %v1169_v47 = vpop.eup %1168  ;;  %v473_v48 = vadd.f32 %v957_v21, %v472_v46  ;;  %v516_v49 = vpack.c.bf16 %v1167_v44, %v1163_v40  ;;  %1180 = vtanh.f32 %v481_v43 }
  0xf4   : > { %v1064_v50 = vpop.f32.mrf.mxu0  ;;  %v517_v51 = vpack.c.bf16 %v1165_v42, %v1169_v47 }
  0xf5   : > { %1182 = vtanh.f32 %v473_v48  ;;  %1082 = vmatprep.mubr.bf16.mxu1 %v516_v49  ;;  %v494_v59 = vadd.f32 %v1064_v50, %v957_v21 }
  0xf6   : > { %1184 = vtanh.f32 %v478_v45  ;;  %v485_v52 = vpop.f32.mrf.mxu0  ;;  %1083 = vmatmul.mubr.bf16.vlgmr.msra.gmra.mxu1 %v517_v51  ;;  %v1171_v54 = vpop.eup %1170 }
  0xf7   : > { %v486_v53 = vadd.f32 %v957_v21, %v485_v52  ;;  %1126 = vmatpush3.bf16.msra.mxu1 %v1158_v13 }
  0xf8   : > { %v1065_v55 = vpop.f32.mrf.mxu0  ;;  %v1173_v56 = vpop.eup %1172  ;;  %1123 = vmatprep.subr.bf16.mxu1 %v1159_v14 }
  0xf9   : > { %v497_v57 = vadd.f32 %v1065_v55, %v957_v21  ;;  %1186 = vtanh.f32 %v486_v53 }
  0xfa   : > { %v1175_v58 = vpop.eup %1174  ;;  %v488_v60 = vpop.f32.mrf.mxu0 }
  0xfb   : > { %v1177_v61 = vpop.eup %1176  ;;  %v489_v62 = vadd.f32 %v957_v21, %v488_v60  ;;  %v518_v63 = vpack.c.bf16 %v1175_v58, %v1171_v54  ;;  %1188 = vtanh.f32 %v497_v57  ;;  %1127 = vmatpush3.bf16.msra.mxu1 %v1159_v14 }
  0xfc   : > { %v519_v0 = vpack.c.bf16 %v1173_v56, %v1177_v61  ;;  %1124 = vmatprep.subr.bf16.mxu1 %v1160_v15 }
  0xfd   : > { %1190 = vtanh.f32 %v489_v62  ;;  %1086 = vmatprep.mubr.bf16.mxu1 %v518_v63 }
  0xfe   : > { %1192 = vtanh.f32 %v494_v59  ;;  %1087 = vmatmul.mubr.bf16.gmra.mxu1 %v519_v0  ;;  %v1179_v1 = vpop.eup %1178 }
  0xff   : > { %1128 = vmatpush3.bf16.msra.mxu1 %v1160_v15 }
 0x100   : > { %v1181_v2 = vpop.eup %1180  ;;  %1125 = vmatprep.subr.bf16.mxu1 %v1161_v16 }
 0x102   : > { %v1183_v3 = vpop.eup %1182 }
 0x103   : > { %v1185_v4 = vpop.eup %1184  ;;  %v520_v5 = vpack.c.bf16 %v1183_v3, %v1179_v1  ;;  %1129 = vmatpush3.bf16.msra.mxu1 %v1161_v16 }
 0x104   : > { %v521_v6 = vpack.c.bf16 %v1181_v2, %v1185_v4 }
 0x105   : > { %1090 = vmatprep.mubr.bf16.mxu1 %v520_v5 }
 0x106   : > { %1091 = vmatmul.mubr.bf16.gmra.mxu1 %v521_v6  ;;  %v1187_v7 = vpop.eup %1186 }
 0x108   : > { %v1189_v8 = vpop.eup %1188 }
 0x10a   : > { %v1191_v9 = vpop.eup %1190 }
 0x10b   : > { %v1193_v10 = vpop.eup %1192  ;;  %v522_v11 = vpack.c.bf16 %v1191_v9, %v1187_v7 }
 0x10c   : > { %v523_v12 = vpack.c.bf16 %v1189_v8, %v1193_v10  ;;  %v987_v10 = vld [vmem:[%s1392_s6] ss:$0 sm:$0xff] }
 0x10d   : > { %1094 = vmatprep.mubr.bf16.mxu1 %v522_v11 }
 0x10e   : > { %1095 = vmatmul.mubr.bf16.gmra.mxu1 %v523_v12 }
 0x1b6   : > { %v1084_v17 = vpop.f32.mrf.mxu1 }
 0x1b7   : > { %v638_v23 = vadd.f32 %v1084_v17, %v978_v18 }
 0x1b8   : > { %v629_v19 = vpop.f32.mrf.mxu1 }
 0x1b9   : > { %v630_v20 = vadd.f32 %v978_v18, %v629_v19 }
 0x1ba   : > { %v1085_v21 = vpop.f32.mrf.mxu1 }
 0x1bb   : > { %v641_v22 = vadd.f32 %v1085_v21, %v978_v18  ;;  %1194 = vtanh.f32 %v630_v20 }
 0x1bc   : > { %v632_v24 = vpop.f32.mrf.mxu1 }
 0x1bd   : > { %v633_v25 = vadd.f32 %v978_v18, %v632_v24  ;;  %1196 = vtanh.f32 %v641_v22 }
 0x1be   : > { %v1088_v26 = vpop.f32.mrf.mxu1 }
 0x1bf   : > { %1198 = vtanh.f32 %v633_v25  ;;  %v654_v31 = vadd.f32 %v1088_v26, %v978_v18 }
 0x1c0   : > { %1200 = vtanh.f32 %v638_v23  ;;  %v645_v27 = vpop.f32.mrf.mxu1 }
 0x1c1   : > { %v646_v28 = vadd.f32 %v978_v18, %v645_v27 }
 0x1c2   : > { %v1089_v29 = vpop.f32.mrf.mxu1 }
 0x1c3   : > { %v657_v30 = vadd.f32 %v1089_v29, %v978_v18  ;;  %1202 = vtanh.f32 %v646_v28 }
 0x1c4   : > { %v648_v32 = vpop.f32.mrf.mxu1 }
 0x1c5   : > { %v649_v33 = vadd.f32 %v978_v18, %v648_v32  ;;  %1204 = vtanh.f32 %v657_v30 }
 0x1c6   : > { %v1092_v34 = vpop.f32.mrf.mxu1 }
 0x1c7   : > { %1206 = vtanh.f32 %v649_v33  ;;  %v670_v42 = vadd.f32 %v1092_v34, %v978_v18 }
 0x1c8   : > { %1208 = vtanh.f32 %v654_v31  ;;  %v661_v35 = vpop.f32.mrf.mxu1  ;;  %v1195_v37 = vpop.eup %1194 }
 0x1c9   : > { %v662_v36 = vadd.f32 %v978_v18, %v661_v35 }
 0x1ca   : > { %v1093_v38 = vpop.f32.mrf.mxu1  ;;  %v1197_v39 = vpop.eup %1196 }
 0x1cb   : > { %v673_v40 = vadd.f32 %v1093_v38, %v978_v18  ;;  %1210 = vtanh.f32 %v662_v36 }
 0x1cc   : > { %v1199_v41 = vpop.eup %1198  ;;  %v664_v43 = vpop.f32.mrf.mxu1 }
 0x1cd   : > { %v1201_v44 = vpop.eup %1200  ;;  %v665_v45 = vadd.f32 %v978_v18, %v664_v43  ;;  %v708_v46 = vpack.c.bf16 %v1199_v41, %v1195_v37  ;;  %1212 = vtanh.f32 %v673_v40 }
 0x1ce   : > { %v709_v47 = vpack.c.bf16 %v1197_v39, %v1201_v44  ;;  %v1096_v48 = vpop.f32.mrf.mxu1 }
 0x1cf   : > { %1214 = vtanh.f32 %v665_v45  ;;  %1106 = vmatprep.mubr.msk.bf16.mxu0 %vm378_vm0, %v708_v46  ;;  %v686_v56 = vadd.f32 %v1096_v48, %v978_v18 }
 0x1d0   : > { %1216 = vtanh.f32 %v670_v42  ;;  %v677_v49 = vpop.f32.mrf.mxu1  ;;  %1107 = vmatmul.mubr.msk.bf16.vlgmr.msra.gmra.mxu0 %vm378_vm0, %v709_v47  ;;  %v1203_v51 = vpop.eup %1202 }
 0x1d1   : > { %v678_v50 = vadd.f32 %v978_v18, %v677_v49 }
 0x1d2   : > { %v1097_v52 = vpop.f32.mrf.mxu1  ;;  %v1205_v53 = vpop.eup %1204 }
 0x1d3   : > { %v689_v54 = vadd.f32 %v1097_v52, %v978_v18  ;;  %1218 = vtanh.f32 %v678_v50 }
 0x1d4   : > { %v1207_v55 = vpop.eup %1206  ;;  %v680_v57 = vpop.f32.mrf.mxu1 }
 0x1d5   : > { %v1209_v58 = vpop.eup %1208  ;;  %v681_v59 = vadd.f32 %v978_v18, %v680_v57  ;;  %v710_v60 = vpack.c.bf16 %v1207_v55, %v1203_v51  ;;  %1220 = vtanh.f32 %v689_v54 }
 0x1d6   : > { %v711_v61 = vpack.c.bf16 %v1205_v53, %v1209_v58 }
 0x1d7   : > { %1222 = vtanh.f32 %v681_v59  ;;  %1110 = vmatprep.mubr.msk.bf16.mxu0 %vm378_vm0, %v710_v60 }
 0x1d8   : > { %1224 = vtanh.f32 %v686_v56  ;;  %1111 = vmatmul.mubr.msk.bf16.gmra.mxu0 %vm378_vm0, %v711_v61  ;;  %v1211_v62 = vpop.eup %1210 }
 0x1da   : > { %v1213_v63 = vpop.eup %1212 }
 0x1dc   : > { %v1215_v0 = vpop.eup %1214 }
 0x1dd   : > { %v1217_v1 = vpop.eup %1216  ;;  %v712_v2 = vpack.c.bf16 %v1215_v0, %v1211_v62 }
 0x1de   : > { %v713_v3 = vpack.c.bf16 %v1213_v63, %v1217_v1 }
 0x1df   : > { %1114 = vmatprep.mubr.msk.bf16.mxu0 %vm378_vm0, %v712_v2 }
 0x1e0   : > { %1115 = vmatmul.mubr.msk.bf16.gmra.mxu0 %vm378_vm0, %v713_v3  ;;  %v1219_v4 = vpop.eup %1218 }
 0x1e2   : > { %v1221_v5 = vpop.eup %1220 }
 0x1e4   : > { %v1223_v6 = vpop.eup %1222 }
 0x1e5   : > { %v1225_v7 = vpop.eup %1224  ;;  %v714_v8 = vpack.c.bf16 %v1223_v6, %v1219_v4 }
 0x1e6   : > { %v715_v9 = vpack.c.bf16 %v1221_v5, %v1225_v7 }
 0x1e7   : > { %1118 = vmatprep.mubr.msk.bf16.mxu1 %vm378_vm0, %v714_v8 }
 0x1e8   : > { %1119 = vmatmul.mubr.msk.bf16.vlgmr.msra.gmra.mxu1 %vm378_vm0, %v715_v9 }
 0x290   : > { %v1108_v11 = vpop.f32.mrf.mxu0 }
 0x291   : > { %v822_v12 = vadd.f32 %v1108_v11, %v987_v10 }
 0x292   : > { %v813_v13 = vpop.f32.mrf.mxu0 }
 0x293   : > { %878 = vst [vmem:[%s1365_s30 + $0x10] sm:$0xff] %v822_v12  ;;  %v814_v14 = vadd.f32 %v987_v10, %v813_v13 }
 0x294   : > { %v1109_v15 = vpop.f32.mrf.mxu0 }
 0x295   : > { %876 = vst [vmem:[%s1365_s30] sm:$0xff] %v814_v14  ;;  %v825_v16 = vadd.f32 %v1109_v15, %v987_v10 }
 0x296   : > { %v816_v17 = vpop.f32.mrf.mxu0 }
 0x297   : > { %879 = vst [vmem:[%s1365_s30 + $0x18] sm:$0xff] %v825_v16  ;;  %v817_v18 = vadd.f32 %v987_v10, %v816_v17 }
 0x298   : > { %v1112_v19 = vpop.f32.mrf.mxu0 }
 0x299   : > { %877 = vst [vmem:[%s1365_s30 + $0x8] sm:$0xff] %v817_v18  ;;  %v838_v20 = vadd.f32 %v1112_v19, %v987_v10 }
 0x29a   : > { %v829_v21 = vpop.f32.mrf.mxu0 }
 0x29b   : > { %882 = vst [vmem:[%s1365_s30 + $0x30] sm:$0xff] %v838_v20  ;;  %v830_v22 = vadd.f32 %v987_v10, %v829_v21 }
 0x29c   : > { %v1113_v23 = vpop.f32.mrf.mxu0 }
 0x29d   : > { %880 = vst [vmem:[%s1365_s30 + $0x20] sm:$0xff] %v830_v22  ;;  %v841_v24 = vadd.f32 %v1113_v23, %v987_v10 }
 0x29e   : > { %v832_v25 = vpop.f32.mrf.mxu0 }
 0x29f   : > { %883 = vst [vmem:[%s1365_s30 + $0x38] sm:$0xff] %v841_v24  ;;  %v833_v26 = vadd.f32 %v987_v10, %v832_v25 }
 0x2a0   : > { %v1116_v27 = vpop.f32.mrf.mxu0 }
 0x2a1   : > { %881 = vst [vmem:[%s1365_s30 + $0x28] sm:$0xff] %v833_v26  ;;  %v854_v28 = vadd.f32 %v1116_v27, %v987_v10 }
 0x2a2   : > { %v845_v29 = vpop.f32.mrf.mxu0 }
 0x2a3   : > { %886 = vst [vmem:[%s1365_s30 + $0x50] sm:$0xff] %v854_v28  ;;  %v846_v30 = vadd.f32 %v987_v10, %v845_v29 }
 0x2a4   : > { %v1117_v31 = vpop.f32.mrf.mxu0 }
 0x2a5   : > { %884 = vst [vmem:[%s1365_s30 + $0x40] sm:$0xff] %v846_v30  ;;  %v857_v32 = vadd.f32 %v1117_v31, %v987_v10 }
 0x2a6   : > { %v848_v33 = vpop.f32.mrf.mxu0 }
 0x2a7   : > { %887 = vst [vmem:[%s1365_s30 + $0x58] sm:$0xff] %v857_v32  ;;  %v849_v34 = vadd.f32 %v987_v10, %v848_v33 }
 0x2a8   : > { %v1120_v35 = vpop.f32.mrf.mxu1 }
 0x2a9   : > { %885 = vst [vmem:[%s1365_s30 + $0x48] sm:$0xff] %v849_v34  ;;  %v870_v36 = vadd.f32 %v1120_v35, %v987_v10 }
 0x2aa   : > { %v861_v37 = vpop.f32.mrf.mxu1 }
 0x2ab   : > { %890 = vst [vmem:[%s1365_s30 + $0x70] sm:$0xff] %v870_v36  ;;  %v862_v38 = vadd.f32 %v987_v10, %v861_v37 }
 0x2ac   : > { %v1121_v39 = vpop.f32.mrf.mxu1 }
 0x2ad   : > { %888 = vst [vmem:[%s1365_s30 + $0x60] sm:$0xff] %v862_v38  ;;  %v873_v40 = vadd.f32 %v1121_v39, %v987_v10 }
 0x2ae   : > { %v864_v41 = vpop.f32.mrf.mxu1 }
 0x2af   : > { %891 = vst [vmem:[%s1365_s30 + $0x78] sm:$0xff] %v873_v40  ;;  %v865_v42 = vadd.f32 %v987_v10, %v864_v41 }
 0x2b1   : > { %889 = vst [vmem:[%s1365_s30 + $0x68] sm:$0xff] %v865_v42 }
 0x2b2 PF: > { %s17_s24 = sadd.s32 1, %s1232_s24  }
 0x2b3   : > { %p14_p4 = scmp.ge.s32.totalorder %s17_s24, 4  }
 0x2b5   :  { %16 = sbr.rel (!%p14_p4) target bundleno = 1 (0x1), region = 78 }

</bundles_post_ra>
